<compile_context>
chip_gen: v5e
topology: v5e:2x2
jax: 0.10.0
libtpu: 0.0.40
codegen_flags: <defaults>
</compile_context>

<pallas_src>
import functools

import jax
import jax.numpy as jnp
from jax.experimental import pallas as pl
from jax.experimental.pallas import tpu as pltpu


# ----------------------------------------------------------------------------
# Pallas kernel: fused  sum_k(z_k)  ->  log_softmax(axis=-1)
# ----------------------------------------------------------------------------
def _make_host_head_kernel(num_inputs):
    def kernel(*refs):
        in_refs = refs[:num_inputs]
        o_ref = refs[num_inputs]

        # Elementwise sum of all party logits, accumulated in f32 (VPU).
        acc = in_refs[0][...].astype(jnp.float32)
        for r in in_refs[1:]:
            acc = acc + r[...].astype(jnp.float32)

        # Numerically stable log-softmax along the last (lane) axis.
        # max / sum are XLU reductions, exp / log go to the EUP slot.
        m = jnp.max(acc, axis=-1, keepdims=True)

        if jnp.dtype(o_ref.dtype) == jnp.float32:
            # Reuse the output block as the 'shifted' scratch: saves one full
            # (TM, D) f32 VMEM temporary, letting TM grow at the same budget.
            o_ref[...] = acc - m
            shifted = o_ref[...]
            lse = jnp.log(jnp.sum(jnp.exp(shifted), axis=-1, keepdims=True))
            o_ref[...] = shifted - lse
        else:
            # Keep 'shifted' in f32 so a narrow output dtype does not perturb
            # the lse computation.
            shifted = acc - m
            lse = jnp.log(jnp.sum(jnp.exp(shifted), axis=-1, keepdims=True))
            o_ref[...] = (shifted - lse).astype(o_ref.dtype)

    return kernel


def _round_up(x, m):
    return (x + m - 1) // m * m


def host_head_log_softmax(z_list, *, out_dtype=None, vmem_budget_bytes=None):
    """Fused sum-of-parties + log-softmax(axis=-1).

    z_list: list of (N, D) arrays (same shape).  Returns (N, D) `out_dtype`
    (defaults to the promoted input dtype, matching the PyTorch module).
    NOTE: at tiny N this path is launch-overhead-bound; plain XLA
    `jax.nn.log_softmax(sum)` is equally good there.  The fused kernel pays off
    once (K+1)*N*D*itemsize bytes of HBM streaming dominates.
    """
    assert len(z_list) >= 1
    z_list = [jnp.asarray(z) for z in z_list]
    N, D = z_list[0].shape
    for z in z_list:
        assert z.shape == (N, D), "all party tensors must share a shape"
    K = len(z_list)

    if out_dtype is None:
        out_dtype = jnp.result_type(*[z.dtype for z in z_list])
    out_dtype = jnp.dtype(out_dtype)

    in_itemsize = z_list[0].dtype.itemsize
    out_itemsize = out_dtype.itemsize

    # ---- Generation-aware VMEM budget -------------------------------------
    try:
        vmem_physical = int(pltpu.get_tpu_info().vmem_capacity_bytes)
    except Exception:  # pragma: no cover - conservative fallback (v7x-sized)
        vmem_physical = 64 * 1024 * 1024
    if vmem_budget_bytes is None:
        # ~5/8 of physical: 80 MiB on 128-MiB chips (v5e/v6e), 40 MiB on v7x.
        vmem_budget_bytes = vmem_physical * 5 // 8

    # ---- Per-row VMEM footprint (honest accounting) ------------------------
    #   K input tiles, double-buffered          : K * 2 * D * in_itemsize
    #   1 output tile, double-buffered          : 2 * D * out_itemsize
    #   compiler temporaries (acc, exp; shifted
    #   lives in o_ref when out_dtype == f32)   : n_temps * D * 4
    n_temps = 2 if out_dtype == jnp.float32 else 3
    bytes_per_row = (K * 2 * in_itemsize + 2 * out_itemsize + n_temps * 4) * D
    tm_max = max(8, (vmem_budget_bytes // bytes_per_row) // 8 * 8)

    # ---- Row-tile selection -------------------------------------------------
    if N <= 8:
        TM = N                      # full-extent block: exempt from (8,128) rule
    else:
        # Keep >=2 grid steps (>=4 once N is big enough) so the "parallel"
        # axis can shard across both TensorCores on v7x.
        target_steps = 4 if N >= 64 else 2
        tm_shard = max(8, _round_up(pl.cdiv(N, target_steps), 8))
        TM = max(8, min(tm_max, tm_shard))   # multiple of 8; trailing block masked

    grid = (pl.cdiv(N, TM),)
    blk = pl.BlockSpec((TM, D), lambda i: (i, 0))

    # ---- Explicit scoped-VMEM limit: footprint + headroom, capped by chip ---
    tile_bytes = TM * bytes_per_row
    vmem_limit = int(min(vmem_physical - (8 << 20),
                         max(tile_bytes + (8 << 20), 32 << 20)))
    vmem_limit = max(vmem_limit, 16 << 20)

    cost = pl.CostEstimate(
        flops=(K - 1 + 4) * N * D,              # K-1 adds + ~4 ops/elem softmax
        transcendentals=N * D + N,              # exp per element + log per row
        bytes_accessed=K * N * D * in_itemsize + N * D * out_itemsize,
    )

    return pl.pallas_call(
        _make_host_head_kernel(K),
        out_shape=jax.ShapeDtypeStruct((N, D), out_dtype),
        grid=grid,
        in_specs=[blk] * K,
        out_specs=blk,
        compiler_params=pltpu.CompilerParams(
            dimension_semantics=("parallel",),
            vmem_limit_bytes=vmem_limit),
        cost_estimate=cost,
    )(*z_list)


# ----------------------------------------------------------------------------
def _reference(z_list):
    out = functools.reduce(jnp.add, [z.astype(jnp.float32) for z in z_list])
    return jax.nn.log_softmax(out, axis=-1)


if __name__ == "__main__":
    key = jax.random.PRNGKey(0)

    # Shapes consistent with the template: the host head receives the
    # flattened guest outputs (batch=2, features = C_out*H*W = 8*16*16 = 2048)
    # from num_parties = 3 guests.
    N, D = 2, 2048
    num_parties = 3

    keys = jax.random.split(key, num_parties)
    z_list = [jax.random.normal(k, (N, D), dtype=jnp.float32) for k in keys]

    out = host_head_log_softmax(z_list)
    out = jax.block_until_ready(out)

    ref = _reference(z_list)
    assert out.shape == (N, D), out.shape
    assert out.dtype == jnp.float32, out.dtype
    assert jnp.allclose(out, ref, atol=1e-5, rtol=1e-5), "mismatch vs reference"
    # log-softmax rows must sum (in prob space) to 1.
    assert jnp.allclose(jnp.sum(jnp.exp(out), axis=-1), 1.0, atol=1e-4)

    print("KERNEL_OK")
</pallas_src>

<mosaic_0001>
module attributes {stable_mosaic.version = 11 : i64} {
  func.func @kernel(%arg0: i32, %arg1: memref<2x2048xf32, #tpu.memory_space<vmem>>, %arg2: memref<2x2048xf32, #tpu.memory_space<vmem>>, %arg3: memref<2x2048xf32, #tpu.memory_space<vmem>>, %arg4: memref<2x2048xf32, #tpu.memory_space<vmem>>) attributes {dimension_semantics = [#tpu.dimension_semantics<parallel>], iteration_bounds = array<i64: 1>, scalar_prefetch = 0 : i64, scratch_operands = 0 : i64, tpu.core_type = #tpu.core_type<tc>, window_params = [{transform_indices = @transform_0, window_bounds = array<i64: 2, 2048>}, {transform_indices = @transform_1, window_bounds = array<i64: 2, 2048>}, {transform_indices = @transform_2, window_bounds = array<i64: 2, 2048>}, {transform_indices = @transform_3, window_bounds = array<i64: 2, 2048>}]} {
    %c0 = arith.constant 0 : index
    %c0_0 = arith.constant 0 : index
    %0 = vector.load %arg1[%c0, %c0_0] : memref<2x2048xf32, #tpu.memory_space<vmem>>, vector<2x2048xf32>
    %c0_1 = arith.constant 0 : index
    %c0_2 = arith.constant 0 : index
    %1 = vector.load %arg2[%c0_1, %c0_2] : memref<2x2048xf32, #tpu.memory_space<vmem>>, vector<2x2048xf32>
    %2 = arith.addf %0, %1 : vector<2x2048xf32>
    %c0_3 = arith.constant 0 : index
    %c0_4 = arith.constant 0 : index
    %3 = vector.load %arg3[%c0_3, %c0_4] : memref<2x2048xf32, #tpu.memory_space<vmem>>, vector<2x2048xf32>
    %4 = arith.addf %2, %3 : vector<2x2048xf32>
    %cst = arith.constant dense<0xFF800000> : vector<2xf32>
    %5 = vector.multi_reduction <maximumf>, %4, %cst [1] : vector<2x2048xf32> to vector<2xf32>
    %6 = vector.shape_cast %5 : vector<2xf32> to vector<2x1xf32>
    %7 = vector.broadcast %6 : vector<2x1xf32> to vector<2x2048xf32>
    %8 = arith.subf %4, %7 : vector<2x2048xf32>
    %c0_5 = arith.constant 0 : index
    %c0_6 = arith.constant 0 : index
    %9 = vector.load %arg4[%c0_5, %c0_6] : memref<2x2048xf32, #tpu.memory_space<vmem>>, vector<2x2048xf32>
    tpu.vector_store %arg4[%c0_5, %c0_6], %8 {strides = array<i32>} : memref<2x2048xf32, #tpu.memory_space<vmem>>, vector<2x2048xf32>,
    %c0_7 = arith.constant 0 : index
    %c0_8 = arith.constant 0 : index
    %10 = vector.load %arg4[%c0_7, %c0_8] : memref<2x2048xf32, #tpu.memory_space<vmem>>, vector<2x2048xf32>
    %11 = math.exp %10 : vector<2x2048xf32>
    %cst_9 = arith.constant dense<0.000000e+00> : vector<2xf32>
    %12 = vector.multi_reduction <add>, %11, %cst_9 [1] : vector<2x2048xf32> to vector<2xf32>
    %13 = vector.shape_cast %12 : vector<2xf32> to vector<2x1xf32>
    %14 = math.log %13 : vector<2x1xf32>
    %15 = vector.broadcast %14 : vector<2x1xf32> to vector<2x2048xf32>
    %16 = arith.subf %10, %15 : vector<2x2048xf32>
    %c0_10 = arith.constant 0 : index
    %c0_11 = arith.constant 0 : index
    %17 = vector.load %arg4[%c0_10, %c0_11] : memref<2x2048xf32, #tpu.memory_space<vmem>>, vector<2x2048xf32>
    tpu.vector_store %arg4[%c0_10, %c0_11], %16 {strides = array<i32>} : memref<2x2048xf32, #tpu.memory_space<vmem>>, vector<2x2048xf32>,
    return
  }
  func.func @transform_0(%arg0: i32) -> (i32, i32) {
    %c0_i32 = arith.constant 0 : i32
    %c0_i32_0 = arith.constant 0 : i32
    return %arg0, %c0_i32 : i32, i32
  }
  func.func @transform_1(%arg0: i32) -> (i32, i32) {
    %c0_i32 = arith.constant 0 : i32
    %c0_i32_0 = arith.constant 0 : i32
    return %arg0, %c0_i32 : i32, i32
  }
  func.func @transform_2(%arg0: i32) -> (i32, i32) {
    %c0_i32 = arith.constant 0 : i32
    %c0_i32_0 = arith.constant 0 : i32
    return %arg0, %c0_i32 : i32, i32
  }
  func.func @transform_3(%arg0: i32) -> (i32, i32) {
    %c0_i32 = arith.constant 0 : i32
    %c0_i32_0 = arith.constant 0 : i32
    return %arg0, %c0_i32 : i32, i32
  }
}

</mosaic_0001>

<bundles_post_ra>
// kernel: tpu_custom_call.1
= control target key start
LH: loop header
LB: loop body
LE: loop exit
PB: predicated region body
PF: predicated region fallthrough
CT: control target
= control target key end

     0   :  { %8 = vsyncpa [#allocation3], 0  ;;  %s506_s0 = inlined_call_operand.hbm [shape: f32[2,2048], index: 0, kind: input, shape index: {}]   ;;  %s507_s1 = inlined_call_operand.hbm [shape: f32[2,2048], index: 1, kind: input, shape index: {}]   ;;  %s508_s2 = inlined_call_operand.hbm [shape: f32[2,2048], index: 2, kind: input, shape index: {}]   ;;  %s509_s3 = inlined_call_operand.hbm [shape: f32[2,2048], index: 3, kind: output, shape index: {}]  }
   0x1   :  { %9 = vsyncpa [#allocation6], 0  ;;  %s27_s14 = sshll.u32 %s507_s1, 4  ;;  %s28_s14 = int_to_ptr.hbm [resolvable:$true] %s27_s14 }
   0x2   :  { %10 = vsyncpa [#allocation4], 0  ;;  %s402_s15 = smov [#allocation5]   ;;  %s16_s19 = sshll.u32 %s506_s0, 4  ;;  %s17_s19 = int_to_ptr.hbm [resolvable:$true] %s16_s19 }
   0x3   :  { %s29_s16 = sshll.u32 %s402_s15, 4  ;;  %s403_s20 = smov [#allocation2]   ;;  %s30_s16 = int_to_ptr.vmem [resolvable:$true] %s29_s16 }
   0x4   :  { %32 = dma.hbm_to_vmem [thread:$0]  %s28_s14, 512, %s30_s16, [#allocation6]  }
   0x5   :  { %s18_s21 = sshll.u32 %s403_s20, 4  ;;  %s38_s24 = sshll.u32 %s508_s2, 4  ;;  %s19_s21 = int_to_ptr.vmem [resolvable:$true] %s18_s21  ;;  %s39_s24 = int_to_ptr.hbm [resolvable:$true] %s38_s24 }
   0x6   :  { %21 = dma.hbm_to_vmem [thread:$0]  %s17_s19, 512, %s19_s21, [#allocation3]  }
   0x7   :  { %s404_s1 = smov [#allocation7]  }
   0x8   :  { %s40_s25 = sshll.u32 %s404_s1, 4  ;;  %s41_s25 = int_to_ptr.vmem [resolvable:$true] %s40_s25 }
   0x9   :  { %43 = dma.hbm_to_vmem [thread:$0]  %s39_s24, 512, %s41_s25, [#allocation6]  }
   0xa   :  { %396 = dma.done.wait [#allocation3], 512  }
   0xb   :  { %397 = vsyncadd [#allocation3], 4294966784 }
   0xc   :  { %398 = dma.done.wait [#allocation6], 1024  }
   0xd   :  { %399 = vsyncadd [#allocation6], 4294966272  ;;  %v56_v0 = vld [vmem:[#allocation2] sm:$0xff]  ;;  %v57_v1 = vld [vmem:[#allocation2 + $0x8] sm:$0xff]  ;;  %vm117_vm0 = vcmask 1041408   ;;  %s406_s0 = smov [#allocation8]  }
   0xe   :  { %v60_v2 = vld [vmem:[#allocation5] sm:$0xff]  ;;  %v61_v3 = vld [vmem:[#allocation5 + $0x8] sm:$0xff]  ;;  %v58_v10 = vld [vmem:[#allocation2 + $0x10] sm:$0xff]  ;;  %s272_s2 = sshll.u32 %s406_s0, 4  ;;  %s274_s28 = sshll.u32 %s509_s3, 4  ;;  %s273_s2 = int_to_ptr.vmem [resolvable:$true] %s272_s2  ;;  %s275_s28 = int_to_ptr.hbm [resolvable:$true] %s274_s28 }
   0xf   :  { %v64_v4 = vadd.f32 %v60_v2, %v56_v0  ;;  %v65_v5 = vadd.f32 %v61_v3, %v57_v1  ;;  %v68_v6 = vld [vmem:[#allocation7] sm:$0xff]  ;;  %v69_v7 = vld [vmem:[#allocation7 + $0x8] sm:$0xff]  ;;  %v62_v11 = vld [vmem:[#allocation5 + $0x10] sm:$0xff]  ;;  %v405_v3 = vmov 269488144  }
  0x10   :  { %v59_v12 = vld [vmem:[#allocation2 + $0x18] sm:$0xff]  ;;  %v66_v14 = vadd.f32 %v62_v11, %v58_v10  ;;  %v70_v16 = vld [vmem:[#allocation7 + $0x10] sm:$0xff] }
  0x11   :  { %v436_v8 = vadd.f32 %v68_v6, %v64_v4  ;;  %v438_v9 = vadd.f32 %v69_v7, %v65_v5  ;;  %v63_v13 = vld [vmem:[#allocation5 + $0x18] sm:$0xff]  ;;  %v461_v4 = vunpack.c.l.s4 %v405_v3 }
  0x12   :  { %v67_v15 = vadd.f32 %v63_v13, %v59_v12  ;;  %v71_v17 = vld [vmem:[#allocation7 + $0x18] sm:$0xff]  ;;  %v442_v18 = vadd.f32 %v70_v16, %v66_v14 }
  0x13   :  { %80 = vst [vmem:[#allocation1] ss:$4 sm:$0xff] %v436_v8  ;;  %v154_v5 = vunpack.c.0.s8 %v461_v4 }
  0x14   :  { %82 = vst [vmem:[#allocation1 + $0x20] ss:$4 sm:$0xff] %v438_v9  ;;  %v75_v21 = vadd.f32 %v71_v17, %v67_v15 }
  0x1a   :  { %v83_v19 = vld.sshfl [vmem:[#allocation1] sm:$0xff pattern:$0x73625140]  ;;  %v84_v20 = vld.sshfl [vmem:[#allocation1 + $0x8] sm:$0xff pattern:$0x73625140] }
  0x1b   :  { %v85_v22 = vld.sshfl [vmem:[#allocation1 + $0x10] sm:$0xff pattern:$0x73625140]  ;;  %v86_v23 = vld.sshfl [vmem:[#allocation1 + $0x18] sm:$0xff pattern:$0x73625140] }
  0x1c   :  { %v87_v24 = vld.sshfl [vmem:[#allocation1 + $0x20] sm:$0xff pattern:$0x73625140]  ;;  %v88_v25 = vld.sshfl [vmem:[#allocation1 + $0x28] sm:$0xff pattern:$0x73625140] }
  0x1d   :  { %v89_v26 = vld.sshfl [vmem:[#allocation1 + $0x30] sm:$0xff pattern:$0x73625140]  ;;  %v90_v27 = vld.sshfl [vmem:[#allocation1 + $0x38] sm:$0xff pattern:$0x73625140] }
  0x1e   :  { %91 = vst [vmem:[#allocation1] ss:$4 sm:$0xff] %v442_v18  ;;  %v118_v28 = vsel %vm117_vm0, %v83_v19, -inf  ;;  %v119_v29 = vsel %vm117_vm0, %v84_v20, -inf  ;;  %v120_v30 = vsel %vm117_vm0, %v85_v22, -inf  ;;  %v121_v31 = vsel %vm117_vm0, %v86_v23, -inf }
  0x1f   :  { %92 = vst [vmem:[#allocation1 + $0x20] ss:$4 sm:$0xff] %v75_v21  ;;  %v122_v32 = vsel %vm117_vm0, %v87_v24, -inf  ;;  %v124_v33 = vsel %vm117_vm0, %v88_v25, -inf  ;;  %v126_v34 = vsel %vm117_vm0, %v89_v26, -inf  ;;  %v128_v35 = vsel %vm117_vm0, %v90_v27, -inf }
  0x20   :  { %v123_v40 = vmax.f32 %v118_v28, %v122_v32  ;;  %v125_v41 = vmax.f32 %v119_v29, %v124_v33  ;;  %v127_v42 = vmax.f32 %v120_v30, %v126_v34  ;;  %v129_v43 = vmax.f32 %v121_v31, %v128_v35 }
  0x25   :  { %v93_v36 = vld.sshfl [vmem:[#allocation1] sm:$0xff pattern:$0x73625140]  ;;  %v94_v37 = vld.sshfl [vmem:[#allocation1 + $0x8] sm:$0xff pattern:$0x73625140] }
  0x26   :  { %v95_v38 = vld.sshfl [vmem:[#allocation1 + $0x10] sm:$0xff pattern:$0x73625140]  ;;  %v96_v39 = vld.sshfl [vmem:[#allocation1 + $0x18] sm:$0xff pattern:$0x73625140] }
  0x27   :  { %v97_v44 = vld.sshfl [vmem:[#allocation1 + $0x20] sm:$0xff pattern:$0x73625140]  ;;  %v98_v45 = vld.sshfl [vmem:[#allocation1 + $0x28] sm:$0xff pattern:$0x73625140] }
  0x28   :  { %v99_v46 = vld.sshfl [vmem:[#allocation1 + $0x30] sm:$0xff pattern:$0x73625140]  ;;  %v100_v47 = vld.sshfl [vmem:[#allocation1 + $0x38] sm:$0xff pattern:$0x73625140] }
  0x29   :  { %v130_v48 = vsel %vm117_vm0, %v93_v36, -inf  ;;  %v132_v49 = vsel %vm117_vm0, %v94_v37, -inf  ;;  %v134_v50 = vsel %vm117_vm0, %v95_v38, -inf  ;;  %v136_v51 = vsel %vm117_vm0, %v96_v39, -inf }
  0x2a   :  { %v131_v52 = vmax.f32 %v123_v40, %v130_v48  ;;  %v133_v53 = vmax.f32 %v125_v41, %v132_v49  ;;  %v135_v54 = vmax.f32 %v127_v42, %v134_v50  ;;  %v137_v55 = vmax.f32 %v129_v43, %v136_v51 }
  0x2b   :  { %v138_v56 = vsel %vm117_vm0, %v97_v44, -inf  ;;  %v140_v57 = vsel %vm117_vm0, %v98_v45, -inf  ;;  %v142_v58 = vsel %vm117_vm0, %v99_v46, -inf  ;;  %v144_v59 = vsel %vm117_vm0, %v100_v47, -inf }
  0x2c   :  { %v139_v60 = vmax.f32 %v131_v52, %v138_v56  ;;  %v141_v61 = vmax.f32 %v133_v53, %v140_v57  ;;  %v143_v62 = vmax.f32 %v135_v54, %v142_v58  ;;  %v145_v63 = vmax.f32 %v137_v55, %v144_v59 }
  0x2e   :  { %v146_v0 = vmax.f32 %v139_v60, %v141_v61  ;;  %v147_v1 = vmax.f32 %v143_v62, %v145_v63 }
  0x30   :  { %v148_v2 = vmax.f32 %v146_v0, %v147_v1 }
  0x32   :  { %149 = vmax.xlane.f32.xlu0 %v148_v2 }
  0xa5   :  { %v150_v6 = vpop.xlane.xlu0 %149 }
  0xa6   :  { %v155_v7 = vperm.slane %v150_v6, %v154_v5 }
  0xa8   :  { %v467_v10 = vsub.f32 %v436_v8, %v155_v7  ;;  %v470_v11 = vsub.f32 %v438_v9, %v155_v7  ;;  %v475_v14 = vsub.f32 %v442_v18, %v155_v7  ;;  %v477_v15 = vsub.f32 %v75_v21, %v155_v7 }
  0xaa   :  { %v169_v12 = vmul.f32 1.442695, %v467_v10  ;;  %v171_v13 = vmul.f32 1.442695, %v470_v11  ;;  %v173_v19 = vmul.f32 1.442695, %v475_v14 }
  0xab   :  { %v175_v8 = vmul.f32 1.442695, %v477_v15 }
  0xac   :  { %290 = vpow2.f32 %v169_v12 }
  0xad   :  { %292 = vpow2.f32 %v171_v13 }
  0xae   :  { %294 = vpow2.f32 %v173_v19 }
  0xaf   :  { %296 = vpow2.f32 %v175_v8 }
  0xb2   :  { %v291_v16 = vpop.eup %290 }
  0xb3   :  { %v293_v17 = vpop.eup %292  ;;  %181 = vst [vmem:[#allocation1] ss:$4 sm:$0xff] %v291_v16 }
  0xb4   :  { %183 = vst [vmem:[#allocation1 + $0x20] ss:$4 sm:$0xff] %v293_v17  ;;  %v295_v18 = vpop.eup %294 }
  0xb5   :  { %v297_v27 = vpop.eup %296 }
  0xba   :  { %v184_v9 = vld.sshfl [vmem:[#allocation1] sm:$0xff pattern:$0x73625140]  ;;  %v185_v20 = vld.sshfl [vmem:[#allocation1 + $0x8] sm:$0xff pattern:$0x73625140] }
  0xbb   :  { %v186_v22 = vld.sshfl [vmem:[#allocation1 + $0x10] sm:$0xff pattern:$0x73625140]  ;;  %v187_v23 = vld.sshfl [vmem:[#allocation1 + $0x18] sm:$0xff pattern:$0x73625140] }
  0xbc   :  { %v188_v24 = vld.sshfl [vmem:[#allocation1 + $0x20] sm:$0xff pattern:$0x73625140]  ;;  %v189_v25 = vld.sshfl [vmem:[#allocation1 + $0x28] sm:$0xff pattern:$0x73625140] }
  0xbd   :  { %v190_v26 = vld.sshfl [vmem:[#allocation1 + $0x30] sm:$0xff pattern:$0x73625140]  ;;  %v191_v21 = vld.sshfl [vmem:[#allocation1 + $0x38] sm:$0xff pattern:$0x73625140] }
  0xbe   :  { %192 = vst [vmem:[#allocation1] ss:$4 sm:$0xff] %v295_v18  ;;  %v218_v28 = vsel %vm117_vm0, %v184_v9, 0.0  ;;  %v219_v29 = vsel %vm117_vm0, %v185_v20, 0.0  ;;  %v221_v31 = vsel %vm117_vm0, %v186_v22, 0.0  ;;  %v223_v33 = vsel %vm117_vm0, %v187_v23, 0.0 }
  0xbf   :  { %193 = vst [vmem:[#allocation1 + $0x20] ss:$4 sm:$0xff] %v297_v27  ;;  %v220_v30 = vadd.f32 %v219_v29, %v218_v28  ;;  %v225_v35 = vsel %vm117_vm0, %v188_v24, 0.0  ;;  %v227_v37 = vsel %vm117_vm0, %v189_v25, 0.0  ;;  %v229_v39 = vsel %vm117_vm0, %v190_v26, 0.0 }
  0xc0   :  { %v231_v42 = vsel %vm117_vm0, %v191_v21, 0.0 }
  0xc1   :  { %v222_v32 = vadd.f32 %v221_v31, %v220_v30 }
  0xc3   :  { %v224_v34 = vadd.f32 %v223_v33, %v222_v32 }
  0xc5   :  { %v226_v36 = vadd.f32 %v225_v35, %v224_v34  ;;  %v194_v40 = vld.sshfl [vmem:[#allocation1] sm:$0xff pattern:$0x73625140]  ;;  %v195_v43 = vld.sshfl [vmem:[#allocation1 + $0x8] sm:$0xff pattern:$0x73625140] }
  0xc6   :  { %v233_v45 = vsel %vm117_vm0, %v194_v40, 0.0  ;;  %v196_v46 = vld.sshfl [vmem:[#allocation1 + $0x10] sm:$0xff pattern:$0x73625140]  ;;  %v235_v48 = vsel %vm117_vm0, %v195_v43, 0.0 }
  0xc7   :  { %v228_v38 = vadd.f32 %v227_v37, %v226_v36  ;;  %v197_v49 = vld.sshfl [vmem:[#allocation1 + $0x18] sm:$0xff pattern:$0x73625140]  ;;  %v237_v51 = vsel %vm117_vm0, %v196_v46, 0.0 }
  0xc8   :  { %v198_v52 = vld.sshfl [vmem:[#allocation1 + $0x20] sm:$0xff pattern:$0x73625140]  ;;  %v239_v54 = vsel %vm117_vm0, %v197_v49, 0.0 }
  0xc9   :  { %v230_v41 = vadd.f32 %v229_v39, %v228_v38  ;;  %v199_v55 = vld.sshfl [vmem:[#allocation1 + $0x28] sm:$0xff pattern:$0x73625140]  ;;  %v241_v57 = vsel %vm117_vm0, %v198_v52, 0.0 }
  0xca   :  { %v200_v58 = vld.sshfl [vmem:[#allocation1 + $0x30] sm:$0xff pattern:$0x73625140]  ;;  %v243_v60 = vsel %vm117_vm0, %v199_v55, 0.0 }
  0xcb   :  { %v232_v44 = vadd.f32 %v231_v42, %v230_v41  ;;  %v201_v61 = vld.sshfl [vmem:[#allocation1 + $0x38] sm:$0xff pattern:$0x73625140]  ;;  %v245_v63 = vsel %vm117_vm0, %v200_v58, 0.0 }
  0xcc   :  { %v247_v1 = vsel %vm117_vm0, %v201_v61, 0.0 }
  0xcd   :  { %v234_v47 = vadd.f32 %v233_v45, %v232_v44 }
  0xcf   :  { %v236_v50 = vadd.f32 %v235_v48, %v234_v47 }
  0xd1   :  { %v238_v53 = vadd.f32 %v237_v51, %v236_v50 }
  0xd3   :  { %v240_v56 = vadd.f32 %v239_v54, %v238_v53 }
  0xd5   :  { %v242_v59 = vadd.f32 %v241_v57, %v240_v56 }
  0xd7   :  { %v244_v62 = vadd.f32 %v243_v60, %v242_v59 }
  0xd9   :  { %v246_v0 = vadd.f32 %v245_v63, %v244_v62 }
  0xdb   :  { %v248_v2 = vadd.f32 %v247_v1, %v246_v0 }
  0xdd   :  { %249 = vadd.xlane.f32.xlu0 %v248_v2 }
 0x150   :  { %v250_v3 = vpop.xlane.xlu0 %249 }
 0x151   :  { %298 = vlog2.f32 %v250_v3 }
 0x157   :  { %v299_v6 = vpop.eup %298 }
 0x158   :  { %v252_v7 = vmul.f32 0.6931472, %v299_v6 }
 0x15a   :  { %v257_v12 = vperm.slane %v252_v7, %v154_v5 }
 0x15c   :  { %v259_v13 = vsub.f32 %v467_v10, %v257_v12  ;;  %v260_v16 = vsub.f32 %v470_v11, %v257_v12  ;;  %v261_v17 = vsub.f32 %v475_v14, %v257_v12  ;;  %v262_v19 = vsub.f32 %v477_v15, %v257_v12 }
 0x15e   :  { %263 = vst [vmem:[#allocation8] sm:$0xff] %v259_v13 }
 0x15f   :  { %264 = vst [vmem:[#allocation8 + $0x8] sm:$0xff] %v260_v16 }
 0x160   :  { %265 = vst [vmem:[#allocation8 + $0x10] sm:$0xff] %v261_v17 }
 0x161   :  { %266 = vst [vmem:[#allocation8 + $0x18] sm:$0xff] %v262_v19 }
 0x162   :  { %277 = dma.vmem_to_hbm [thread:$0]  %s273_s2, 512, %s275_s28, [#allocation4]  }
 0x163   :  { %400 = dma.done.wait [#allocation4], 512  }
 0x164   :  { %401 = vsyncadd [#allocation4], 4294966784 }
 0x165   :  { %282 = vsyncpa [#allocation3], 1 }
 0x166   :  { %283 = vsyncpa [#allocation6], 1 }
 0x167   :  { %284 = vsyncpa [#allocation4], 1 }

</bundles_post_ra>
